<compile_context>
chip_gen: v6e
topology: v6e:2x2x1
jax: 0.10.0
libtpu: 0.0.40
codegen_flags: <defaults>
</compile_context>

<pallas_src>
import jax
import jax.numpy as jnp
from jax.experimental import pallas as pl
from jax.experimental.pallas import tpu as pltpu

MAX_TB = 4096  # max batch-tile rows


def value_net_kernel(x_ref,            # (TB, num_inputs)
                     w0_ref, b0_ref,   # (num_inputs, H0), (1, H0)
                     w1_ref, b1_ref,   # (H0, H1), (1, H1)
                     vw_ref, vb_ref,   # (1, H1), (1, 1)   -- head as a row
                     out_ref):         # (TB, 1)
    x = x_ref[...]

    h = jnp.dot(x, w0_ref[...], preferred_element_type=jnp.float32) + b0_ref[...]
    h = jnp.maximum(h, 0.0)
    h = jnp.dot(h, w1_ref[...], preferred_element_type=jnp.float32) + b1_ref[...]
    h = jnp.maximum(h, 0.0)

    # Value head: N=1 matmul replaced by VPU multiply + lane reduction (XLU).
    v = jnp.sum(h * vw_ref[...], axis=-1, keepdims=True) + vb_ref[...]   # (TB, 1)

    out_ref[...] = v


def _pick_tile(B):
    """Batch tile size: multiple of 8 (or == B), capped, >=2 tiles when possible."""
    if B <= 8:
        return B                       # single full-extent tile
    tb = min(MAX_TB, pl.cdiv(B, 2))    # aim for >= 2 tiles (v7x: both TCs busy)
    tb = ((tb + 7) // 8) * 8           # (8, 128) rule: sublane dim multiple of 8
    return min(tb, MAX_TB)


def value_net_forward(params, x):
    """ValueNet forward in one Pallas kernel. Returns v of shape (B, 1)."""
    B, num_inputs = x.shape
    H0 = params["w0"].shape[1]
    H1 = params["w1"].shape[1]

    TB = _pick_tile(B)
    grid = (pl.cdiv(B, TB),)

    resident = lambda shape: pl.BlockSpec(shape, lambda i: (0, 0))

    in_specs = [
        pl.BlockSpec((TB, num_inputs), lambda i: (i, 0)),   # x streams
        resident((num_inputs, H0)), resident((1, H0)),      # layer 0 (VMEM-resident)
        resident((H0, H1)), resident((1, H1)),              # layer 1
        resident((1, H1)), resident((1, 1)),                # value head
    ]
    out_specs = pl.BlockSpec((TB, 1), lambda i: (i, 0))
    out_shape = jax.ShapeDtypeStruct((B, 1), jnp.float32)

    flops = 2 * B * (num_inputs * H0 + H0 * H1 + H1)
    weight_bytes = 4 * (num_inputs * H0 + H0 + H0 * H1 + H1 + H1 + 1)
    bytes_accessed = 4 * (B * num_inputs + B * 1) + weight_bytes

    out = pl.pallas_call(
        value_net_kernel,
        out_shape=out_shape,
        grid=grid,
        in_specs=in_specs,
        out_specs=out_specs,
        compiler_params=pltpu.CompilerParams(
            dimension_semantics=("parallel",)),
        cost_estimate=pl.CostEstimate(
            flops=flops, transcendentals=0, bytes_accessed=bytes_accessed),
    )(x, params["w0"], params["b0"], params["w1"], params["b1"],
      params["vw"], params["vb"])

    return out   # (B, 1)


def _init_linear(key, fan_in, fan_out):
    """PyTorch-style Linear init: U(-1/sqrt(fan_in), 1/sqrt(fan_in))."""
    kw, kb = jax.random.split(key)
    bound = 1.0 / (fan_in ** 0.5)
    w = jax.random.uniform(kw, (fan_in, fan_out), jnp.float32, -bound, bound)
    b = jax.random.uniform(kb, (1, fan_out), jnp.float32, -bound, bound)
    return w, b


def init_params(key, num_inputs, hidden=(64, 64)):
    k0, k1, kv = jax.random.split(key, 3)
    w0, b0 = _init_linear(k0, num_inputs, hidden[0])
    w1, b1 = _init_linear(k1, hidden[0], hidden[1])
    vw, vb = _init_linear(kv, hidden[1], 1)          # (H1, 1), (1, 1)
    return {
        "w0": w0, "b0": b0,
        "w1": w1, "b1": b1,
        "vw": vw.T,          # stored as a (1, H1) row for the in-kernel reduction
        "vb": vb,            # (1, 1)
    }


def reference_forward(params, x):
    """Pure-JAX reference matching the PyTorch ValueNet forward."""
    h = jax.nn.relu(x @ params["w0"] + params["b0"])
    h = jax.nn.relu(h @ params["w1"] + params["b1"])
    v = h @ params["vw"].T + params["vb"]
    return v


if __name__ == "__main__":
    key = jax.random.PRNGKey(0)
    k_param, k_x = jax.random.split(key)

    B, NUM_INPUTS = 16, 32
    params = init_params(k_param, NUM_INPUTS, hidden=(64, 64))
    x = jax.random.normal(k_x, (B, NUM_INPUTS), jnp.float32)

    v = value_net_forward(params, x)
    jax.block_until_ready(v)

    v_ref = reference_forward(params, x)
    assert v.shape == (B, 1)
    assert jnp.allclose(v, v_ref, atol=1e-5), float(jnp.max(jnp.abs(v - v_ref)))

    print("KERNEL_OK")
</pallas_src>

<mosaic_0001>
module attributes {stable_mosaic.version = 11 : i64} {
  func.func @value_net_kernel(%arg0: i32, %arg1: memref<8x32xf32, #tpu.memory_space<vmem>>, %arg2: memref<32x64xf32, #tpu.memory_space<vmem>>, %arg3: memref<1x64xf32, #tpu.memory_space<vmem>>, %arg4: memref<64x64xf32, #tpu.memory_space<vmem>>, %arg5: memref<1x64xf32, #tpu.memory_space<vmem>>, %arg6: memref<1x64xf32, #tpu.memory_space<vmem>>, %arg7: memref<1x1xf32, #tpu.memory_space<vmem>>, %arg8: memref<8x1xf32, #tpu.memory_space<vmem>>) attributes {dimension_semantics = [#tpu.dimension_semantics<parallel>], iteration_bounds = array<i64: 2>, scalar_prefetch = 0 : i64, scratch_operands = 0 : i64, tpu.core_type = #tpu.core_type<tc>, window_params = [{transform_indices = @transform_0, window_bounds = array<i64: 8, 32>}, {pipeline_mode = #tpu.pipeline_mode<synchronous>, transform_indices = @transform_1, window_bounds = array<i64: 32, 64>}, {pipeline_mode = #tpu.pipeline_mode<synchronous>, transform_indices = @transform_2, window_bounds = array<i64: 1, 64>}, {pipeline_mode = #tpu.pipeline_mode<synchronous>, transform_indices = @transform_3, window_bounds = array<i64: 64, 64>}, {pipeline_mode = #tpu.pipeline_mode<synchronous>, transform_indices = @transform_4, window_bounds = array<i64: 1, 64>}, {pipeline_mode = #tpu.pipeline_mode<synchronous>, transform_indices = @transform_5, window_bounds = array<i64: 1, 64>}, {pipeline_mode = #tpu.pipeline_mode<synchronous>, transform_indices = @transform_6, window_bounds = array<i64: 1, 1>}, {transform_indices = @transform_7, window_bounds = array<i64: 8, 1>}]} {
    %c0 = arith.constant 0 : index
    %c0_0 = arith.constant 0 : index
    %0 = vector.load %arg1[%c0, %c0_0] : memref<8x32xf32, #tpu.memory_space<vmem>>, vector<8x32xf32>
    %c0_1 = arith.constant 0 : index
    %c0_2 = arith.constant 0 : index
    %1 = vector.load %arg2[%c0_1, %c0_2] : memref<32x64xf32, #tpu.memory_space<vmem>>, vector<32x64xf32>
    %cst = arith.constant dense<0.000000e+00> : vector<8x64xf32>
    %2 = tpu.matmul %0, %1, %cst {dimension_numbers = #tpu.dot_dimension_numbers<[1], [0], [0], [1], [0, 0, 1, 1], [], []>} : vector<8x32xf32>, vector<32x64xf32>, vector<8x64xf32> -> vector<8x64xf32>
    %c0_3 = arith.constant 0 : index
    %c0_4 = arith.constant 0 : index
    %3 = vector.load %arg3[%c0_3, %c0_4] : memref<1x64xf32, #tpu.memory_space<vmem>>, vector<1x64xf32>
    %4 = vector.broadcast %3 : vector<1x64xf32> to vector<8x64xf32>
    %5 = arith.addf %2, %4 : vector<8x64xf32>
    %cst_5 = arith.constant 0.000000e+00 : f32
    %6 = vector.broadcast %cst_5 : f32 to vector<8x64xf32>
    %7 = arith.maximumf %5, %6 : vector<8x64xf32>
    %c0_6 = arith.constant 0 : index
    %c0_7 = arith.constant 0 : index
    %8 = vector.load %arg4[%c0_6, %c0_7] : memref<64x64xf32, #tpu.memory_space<vmem>>, vector<64x64xf32>
    %cst_8 = arith.constant dense<0.000000e+00> : vector<8x64xf32>
    %9 = tpu.matmul %7, %8, %cst_8 {dimension_numbers = #tpu.dot_dimension_numbers<[1], [0], [0], [1], [0, 0, 1, 1], [], []>} : vector<8x64xf32>, vector<64x64xf32>, vector<8x64xf32> -> vector<8x64xf32>
    %c0_9 = arith.constant 0 : index
    %c0_10 = arith.constant 0 : index
    %10 = vector.load %arg5[%c0_9, %c0_10] : memref<1x64xf32, #tpu.memory_space<vmem>>, vector<1x64xf32>
    %11 = vector.broadcast %10 : vector<1x64xf32> to vector<8x64xf32>
    %12 = arith.addf %9, %11 : vector<8x64xf32>
    %cst_11 = arith.constant 0.000000e+00 : f32
    %13 = vector.broadcast %cst_11 : f32 to vector<8x64xf32>
    %14 = arith.maximumf %12, %13 : vector<8x64xf32>
    %c0_12 = arith.constant 0 : index
    %c0_13 = arith.constant 0 : index
    %15 = vector.load %arg6[%c0_12, %c0_13] : memref<1x64xf32, #tpu.memory_space<vmem>>, vector<1x64xf32>
    %16 = vector.broadcast %15 : vector<1x64xf32> to vector<8x64xf32>
    %17 = arith.mulf %14, %16 : vector<8x64xf32>
    %cst_14 = arith.constant dense<0.000000e+00> : vector<8xf32>
    %18 = vector.multi_reduction <add>, %17, %cst_14 [1] : vector<8x64xf32> to vector<8xf32>
    %19 = vector.shape_cast %18 : vector<8xf32> to vector<8x1xf32>
    %c0_15 = arith.constant 0 : index
    %c0_16 = arith.constant 0 : index
    %20 = vector.load %arg7[%c0_15, %c0_16] : memref<1x1xf32, #tpu.memory_space<vmem>>, vector<1x1xf32>
    %21 = vector.broadcast %20 : vector<1x1xf32> to vector<8x1xf32>
    %22 = arith.addf %19, %21 : vector<8x1xf32>
    %c0_17 = arith.constant 0 : index
    %c0_18 = arith.constant 0 : index
    %23 = vector.load %arg8[%c0_17, %c0_18] : memref<8x1xf32, #tpu.memory_space<vmem>>, vector<8x1xf32>
    tpu.vector_store %arg8[%c0_17, %c0_18], %22 {strides = array<i32>} : memref<8x1xf32, #tpu.memory_space<vmem>>, vector<8x1xf32>,
    return
  }
  func.func @transform_0(%arg0: i32) -> (i32, i32) {
    %c0_i32 = arith.constant 0 : i32
    %c0_i32_0 = arith.constant 0 : i32
    return %arg0, %c0_i32 : i32, i32
  }
  func.func @transform_1(%arg0: i32) -> (i32, i32) {
    %c0_i32 = arith.constant 0 : i32
    %c0_i32_0 = arith.constant 0 : i32
    %c0_i32_1 = arith.constant 0 : i32
    return %c0_i32, %c0_i32_0 : i32, i32
  }
  func.func @transform_2(%arg0: i32) -> (i32, i32) {
    %c0_i32 = arith.constant 0 : i32
    %c0_i32_0 = arith.constant 0 : i32
    %c0_i32_1 = arith.constant 0 : i32
    return %c0_i32, %c0_i32_0 : i32, i32
  }
  func.func @transform_3(%arg0: i32) -> (i32, i32) {
    %c0_i32 = arith.constant 0 : i32
    %c0_i32_0 = arith.constant 0 : i32
    %c0_i32_1 = arith.constant 0 : i32
    return %c0_i32, %c0_i32_0 : i32, i32
  }
  func.func @transform_4(%arg0: i32) -> (i32, i32) {
    %c0_i32 = arith.constant 0 : i32
    %c0_i32_0 = arith.constant 0 : i32
    %c0_i32_1 = arith.constant 0 : i32
    return %c0_i32, %c0_i32_0 : i32, i32
  }
  func.func @transform_5(%arg0: i32) -> (i32, i32) {
    %c0_i32 = arith.constant 0 : i32
    %c0_i32_0 = arith.constant 0 : i32
    %c0_i32_1 = arith.constant 0 : i32
    return %c0_i32, %c0_i32_0 : i32, i32
  }
  func.func @transform_6(%arg0: i32) -> (i32, i32) {
    %c0_i32 = arith.constant 0 : i32
    %c0_i32_0 = arith.constant 0 : i32
    %c0_i32_1 = arith.constant 0 : i32
    return %c0_i32, %c0_i32_0 : i32, i32
  }
  func.func @transform_7(%arg0: i32) -> (i32, i32) {
    %c0_i32 = arith.constant 0 : i32
    %c0_i32_0 = arith.constant 0 : i32
    return %arg0, %c0_i32 : i32, i32
  }
}

</mosaic_0001>

<bundles_post_ra>
// kernel: tpu_custom_call.1
= control target key start
LH: loop header
LB: loop body
LE: loop exit
PB: predicated region body
PF: predicated region fallthrough
CT: control target
= control target key end

     0   :  { %s1042_s0 = inlined_call_operand.hbm [shape: f32[16,32], index: 0, kind: input, shape index: {}]   ;;  %s1043_s1 = inlined_call_operand.hbm [shape: f32[32,64], index: 1, kind: input, shape index: {}]   ;;  %s1044_s2 = inlined_call_operand.vmem [shape: f32[1,64], index: 2, kind: input, shape index: {}]   ;;  %s1045_s3 = inlined_call_operand.hbm [shape: f32[64,64], index: 3, kind: input, shape index: {}]   ;;  %s1046_s4 = inlined_call_operand.vmem [shape: f32[1,64], index: 4, kind: input, shape index: {}]   ;;  %s1047_s5 = inlined_call_operand.vmem [shape: f32[1,64], index: 5, kind: input, shape index: {}]   ;;  %s1048_s6 = inlined_call_operand.<no memory space> [shape: f32[1,1], index: 6, kind: input, shape index: {}]   ;;  %s1049_s7 = inlined_call_operand.vmem [shape: f32[16,1], index: 7, kind: output, shape index: {}]  }
   0x1   :  { %v12_v0 = vstv %s1048_s6 }
   0x2   :  { %13 = vst [vmem:[#allocation2] sm:$0x1] %v12_v0 }
   0x3   :  { %14 = vsyncpa [#allocation4], 0 }
   0x4   :  { %16 = vsyncpa [#allocation4 + $0x1], 0 }
   0x5   :  { %17 = vsyncpa [#allocation6], 0  ;;  %s905_s26 = smov 0   ;;  %s907_s27 = smov 0  }
   0x6   :  { %s909_s28 = smov 0   ;;  %s911_s29 = smov 0  }
   0x7 LB: > { %s924_s6 = sadd.s32 4294967295, %s853_s29   ;;  %p43_p0 = scmp.ne.s32.totalorder %s845_s27, %s841_s26  ;;  %s853_s29 = sphi %s911_s29, %s1065_s29   ;;  %s849_s28 = sphi %s909_s28, %s1064_s28   ;;  %s845_s27 = sphi %s907_s27, %s1063_s27   ;;  %s841_s26 = sphi %s905_s26, %s1062_s26  }
   0x8   : > { %p1050_p1 = scmp.eq.s32.totalorder %s924_s6, 0  ;;  %p608_p2 = scmp.ge.s32.totalorder %s853_s29, 1 }
   0x9   : > { %p206_p3 = scmp.lt.s32.totalorder %s853_s29, 3  ;;  %s855_s9 = smov [#allocation5]  }
   0xa   : > { %p932_p4 = por %p1050_p1, %p43_p0  ;;  %s218_s10 = sshll.u32 %s855_s9, 4  ;;  %s219_s10 = int_to_ptr.vmem [resolvable:$true] %s218_s10 }
   0xb   : > { %p936_p5 = pnand %p608_p2, %p206_p3  ;;  %s856_s12 = smov [#allocation7]  }
   0xc   : > { %s1053_s30 = scalar_select %p932_p4, 1, 0 }
   0xd   : > { %s1054_s8 = scalar_select %p936_p5, 1, 0 }
   0xe   : > { %p681_p6 = pneg %p936_p5  ;;  %s234_s13 = sshll.u32 %s856_s12, 4  ;;  %s235_s13 = int_to_ptr.vmem [resolvable:$true] %s234_s13 }
   0xf   : > { %s746_s14 = scalar_lea.vmem %s219_s10, 512  ;;  %p754_p12 = scmp.lt.s32.totalorder %s219_s10, %s219_s10 }
  0x10   : > { %p944_p7 = pnand %p681_p6, %p1050_p1  ;;  %p747_p9 = scmp.ne.s32.totalorder %s219_s10, %s746_s14 }
  0x11   : > { %p755_p13 = scmp.lt.s32.totalorder %s746_s14, %s746_s14 }
  0x12   : > { %p737_p8 = pneg %p944_p7 }
  0x13   : > { %p756_p0 = por %p755_p13, %p754_p12 }
  0x14   : > { %p749_p10 = pnand %p747_p9, %p737_p8 }
  0x16   : > { %p750_p11 = pneg %p749_p10 }
  0x18   : > { %p757_p2 = pnand %p756_p0, %p750_p11 }
  0x1a   : > { %760 = shalt.err (!%p757_p2)
}
  0x1b   : > { %s857_s15 = smov 128   ;;  %s858_s16 = smov 8  }
  0x1c   : > { %684 = dma.hbm_to_vmem [thread:$0]  (!%p944_p7), %s1043_s1, 512, %s219_s10, [#allocation6], %s857_s15, %s857_s15, %s858_s16  }
  0x1d   : > { %s772_s19 = scalar_lea.vmem %s235_s13, 1024  ;;  %p780_p10 = scmp.lt.s32.totalorder %s235_s13, %s235_s13 }
  0x1e   : > { %p773_p3 = scmp.ne.s32.totalorder %s235_s13, %s772_s19  ;;  %p781_p1 = scmp.lt.s32.totalorder %s772_s19, %s772_s19 }
  0x20   : > { %p775_p6 = pnand %p773_p3, %p737_p8  ;;  %p782_p12 = por %p781_p1, %p780_p10 }
  0x22   : > { %p776_p9 = pneg %p775_p6 }
  0x24   : > { %p783_p11 = pnand %p782_p12, %p776_p9 }
  0x26   : > { %786 = shalt.err (!%p783_p11)
}
  0x27   : > { %687 = dma.hbm_to_vmem [thread:$0]  (!%p944_p7), %s1045_s3, 1024, %s235_s13, [#allocation6], %s857_s15, %s857_s15, %s858_s16  }
  0x28   : > { %s967_s22 = sadd.s32 1, %s853_s29   ;;  %s30_s23 = sadd.s32 1, %s849_s28 }
  0x29   : > { %s27_s24 = ssub.s32 %s853_s29, %s967_s22  ;;  %p37_p1 = scmp.ne.s32.totalorder %s849_s28, %s845_s27 }
  0x2a   : > { %p28_p8 = scmp.eq.s32.totalorder %s27_s24, 0  ;;  %p38_p13 = scmp.eq.s32.totalorder %s853_s29, 0 }
  0x2b   : > { %p694_p0 = scmp.lt.s32.totalorder %s853_s29, 2  ;;  %s257_s25 = sand.u32 1, %s849_s28  }
  0x2c   : > { %s978_s26 = scalar_select %p28_p8, %s849_s28, %s30_s23  }
  0x2d   : > { %p39_p2 = por %p38_p13, %p37_p1  ;;  %s612_s9 = sshll.u32 %s257_s25, 3 }
  0x2e   : > { %s613_s10 = sshll.u32 %s853_s29, 7  ;;  %s261_s13 = scalar_lea.vmem [#allocation3], %s612_s9 }
  0x2f   : > { %s984_s14 = scalar_lea.hbm %s1042_s0, %s613_s10  ;;  %s268_s15 = sshll.u32 %s261_s13, 4  ;;  %s269_s15 = int_to_ptr.vmem [resolvable:$true] %s268_s15 }
  0x30   : > { %p986_p7 = pnand %p694_p0, %p39_p2  ;;  %s258_s17 = scalar_lea.sflag [#allocation4], %s257_s25 }
  0x31   : > { %s787_s18 = scalar_lea.hbm %s984_s14, 128  ;;  %s792_s20 = scalar_lea.hbm %s1042_s0, 256 }
  0x32   : > { %p788_p3 = scmp.ne.s32.totalorder %s984_s14, %s787_s18  ;;  %p789_p6 = pneg %p986_p7 }
  0x33   : > { %p793_p12 = scmp.lt.s32.totalorder %s984_s14, %s1042_s0  ;;  %p794_p11 = scmp.lt.s32.totalorder %s792_s20, %s787_s18 }
  0x34   : > { %p790_p9 = pnand %p789_p6, %p788_p3 }
  0x35   : > { %p795_p1 = por %p794_p11, %p793_p12 }
  0x36   : > { %p791_p10 = pneg %p790_p9 }
  0x38   : > { %p796_p8 = pnand %p795_p1, %p791_p10 }
  0x3a   : > { %799 = shalt.err (!%p796_p8)
}
  0x3b   : > { %s800_s24 = scalar_lea.vmem %s269_s15, 128  ;;  %s859_s25 = smov [#allocation3]  }
  0x3c   : > { %p801_p13 = scmp.ne.s32.totalorder %s269_s15, %s800_s24  ;;  %s805_s9 = sshll.u32 %s859_s25, 4  ;;  %s806_s9 = int_to_ptr.vmem [resolvable:$false] %s805_s9 }
  0x3d   : > { %s807_s10 = scalar_lea.vmem %s806_s9, 256  ;;  %p808_p3 = scmp.lt.s32.totalorder %s269_s15, %s806_s9 }
  0x3e   : > { %p803_p0 = pnand %p801_p13, %p789_p6  ;;  %p809_p9 = scmp.lt.s32.totalorder %s807_s10, %s800_s24 }
  0x40   : > { %p804_p2 = pneg %p803_p0  ;;  %p810_p4 = por %p809_p9, %p808_p3 }
  0x42   : > { %p811_p5 = pnand %p810_p4, %p804_p2 }
  0x44   : > { %814 = shalt.err (!%p811_p5)
}
  0x45   : > { %691 = dma.hbm_to_vmem [thread:$0]  (!%p986_p7), %s984_s14, 128, %s269_s15, %s258_s17  }
  0x46   : > { %p1057_p10 = scmp.ne.s32.totalorder %s1054_s8, 0 }
  0x47   : > { %s279_s11 = sand.u32 (!%p1057_p10), 1, %s845_s27   ;;  %p1058_p6 = scmp.ne.s32.totalorder (!%p1057_p10), %s1053_s30, 0 }
  0x48   : > { %277 = sbr.rel (%p1057_p10) target bundleno = 629 (0x275), region = 48  ;;  %s615_s12 = sshll.u32 (!%p1057_p10), %s279_s11, 3 }
  0x49   : > { %s280_s13 = scalar_lea.sflag (!%p1057_p10), [#allocation4], %s279_s11  ;;  %s283_s18 = scalar_lea.vmem (!%p1057_p10), [#allocation3], %s615_s12 }
  0x4d   : > { %832 = dma.done.wait (%p1058_p6), %s280_s13, 128  }
  0x4e   : > { %834 = vsyncadd (%p1058_p6), %s280_s13, 4294967168  ;;  %p1059_p4 = scmp.eq.s32.totalorder %s924_s6, 0 }
  0x50   : > { %836 = dma.done.wait (%p1059_p4), [#allocation6], 1536   ;;  %p1060_p5 = pmov %p1059_p4 }
  0x51   : > { %v860_v1 = vmov 0.0   ;;  %vm861_vm0 = vmmov 0   ;;  %v329_v2 = vld [vmem:[#allocation5 + $0x18] sm:$0xff]  ;;  %v328_v3 = vld [vmem:[#allocation5 + $0x10] sm:$0xff]  ;;  %v327_v5 = vld [vmem:[#allocation5 + $0x8] sm:$0xff]  ;;  %vm337_vm1 = vcmask 261120  }
  0x52   : > { %838 = vsyncadd (%p1060_p5), [#allocation6], 4294965760  ;;  %641 = vmatprep.subr.mxu0 %v860_v1  ;;  %649 = vmatprep.mubr.msk.f32.mxu0 %vm861_vm0, %v860_v1  ;;  %v419_v4 = vld [vmem:[#allocation7 + $0x38] sm:$0xff]  ;;  %v418_v6 = vld [vmem:[#allocation7 + $0x30] sm:$0xff]  ;;  %vm427_vm2 = vcmask 523264   ;;  %p321_p7 = scmp.lt.s32.totalorder %s924_s6, 1 }
  0x53   : > { %652 = vmatprep.subr.mxu1 %v860_v1  ;;  %668 = vmatprep.mubr.msk.f32.mxu1 %vm861_vm0, %v860_v1  ;;  %v417_v7 = vld [vmem:[#allocation7 + $0x28] sm:$0xff]  ;;  %v326_v8 = vld [vmem:[#allocation5] sm:$0xff]  ;;  %v325_v9 = vld [vmem:[%s283_s18] sm:$0xff]  ;;  %vm521_vm3 = vcmask 7168  }
  0x54   : > { %642 = vmatpush3.msra.mxu0 %v329_v2  ;;  %653 = vmatpush3.msra.mxu1 %v419_v4  ;;  %v416_v10 = vld [vmem:[#allocation7 + $0x20] sm:$0xff]  ;;  %v415_v11 = vld [vmem:[#allocation7 + $0x18] sm:$0xff]  ;;  %v414_v12 = vld [vmem:[#allocation7 + $0x10] sm:$0xff]  ;;  %s1067_s6 = smov (!%p321_p7, %s924_s6), 1 }
  0x55   : > { %643 = vmatprep.subr.mxu0 %v860_v1  ;;  %654 = vmatprep.subr.mxu1 %v860_v1  ;;  %v413_v13 = vld [vmem:[#allocation7 + $0x8] sm:$0xff]  ;;  %v412_v14 = vld [vmem:[#allocation7] sm:$0xff]  ;;  %s618_s29 = sshll.u32 %s1067_s6, 3 }
  0x56   : > { %644 = vmatpush3.msra.mxu0 %v328_v3  ;;  %655 = vmatpush3.msra.mxu1 %v418_v6  ;;  %v619_v15 = vld [vmem:[%s1044_s2] ss:$0 sm:$0xff]  ;;  %s324_s21 = scalar_lea.vmem %s1049_s7, %s618_s29 }
  0x57   : > { %645 = vmatprep.subr.mxu0 %v860_v1  ;;  %656 = vmatprep.subr.mxu1 %v860_v1  ;;  %v621_v20 = vld [vmem:[%s1046_s4] ss:$0 sm:$0xff] }
  0x58   : > { %646 = vmatpush3.msra.mxu0 %v327_v5  ;;  %657 = vmatpush3.msra.mxu1 %v417_v7  ;;  %v623_v24 = vld [vmem:[%s1047_s5] ss:$0 sm:$0xff] }
  0x59   : > { %647 = vmatprep.subr.mxu0 %v860_v1  ;;  %658 = vmatprep.subr.mxu1 %v860_v1  ;;  %v624_v28 = vld [vmem:[#allocation2] ss:$0 sm:$0xff] }
  0x5a   : > { %648 = vmatpush3.msra.mxu0 %v326_v8  ;;  %659 = vmatpush3.msra.mxu1 %v416_v10 }
  0x5b   : > { %650 = vmatmul.mubr.msk.f32.vlgmr.msra.gmra.mxu0 %vm337_vm1, %v325_v9  ;;  %660 = vmatprep.subr.mxu1 %v860_v1 }
  0x5c   : > { %661 = vmatpush3.msra.mxu1 %v415_v11 }
  0x5d   : > { %662 = vmatprep.subr.mxu1 %v860_v1 }
  0x5e   : > { %663 = vmatpush3.msra.mxu1 %v414_v12 }
  0x5f   : > { %664 = vmatprep.subr.mxu1 %v860_v1 }
  0x60   : > { %665 = vmatpush3.msra.mxu1 %v413_v13 }
  0x61   : > { %666 = vmatprep.subr.mxu1 %v860_v1 }
  0x62   : > { %667 = vmatpush3.msra.mxu1 %v412_v14 }
 0x11b   : > { %v407_v16 = vpop.f32.mrf.mxu0 }
 0x11c   : > { %v408_v17 = vadd.f32 %v619_v15, %v407_v16 }
 0x11d   : > { %v651_v18 = vpop.f32.mrf.mxu0 }
 0x11e   : > { %v411_v19 = vmax.f32 %v408_v17, 0.0 }
 0x120   : > { %669 = vmatmul.mubr.msk.f32.vlgmr.msra.gmra.mxu1 %vm427_vm2, %v411_v19 }
 0x1e0   : > { %v497_v21 = vpop.f32.mrf.mxu1 }
 0x1e1   : > { %v498_v22 = vadd.f32 %v621_v20, %v497_v21 }
 0x1e2   : > { %v670_v23 = vpop.f32.mrf.mxu1 }
 0x1e3   : > { %v501_v25 = vmax.f32 %v498_v22, 0.0 }
 0x1e5   : > { %v509_v26 = vmul.f32 %v623_v24, %v501_v25 }
 0x1e7   : > { %v510_v27 = vsel %vm427_vm2, %v509_v26, 0.0 }
 0x1e8   : > { %511 = vadd.xlane.f32.xlu0 %v510_v27 }
 0x271   : > { %v512_v29 = vpop.xlane.xlu0 %511 }
 0x272   : > { %v520_v30 = vadd.f32 %v624_v28, %v512_v29 }
 0x274   : > { %522 = vst.msk [vmem:[%s324_s21] sm:$0xff] %vm521_vm3, %v520_v30 }
 0x275 PF: > { %s1061_s23 = smov %s978_s26  ;;  %p20_p12 = scmp.ge.s32.totalorder %s967_s22, 4  }
 0x276   : > { %s1062_s26 = smov %s845_s27  ;;  %s1063_s27 = smov %s849_s28 }
 0x277   : > { %s1064_s28 = smov %s1061_s23  ;;  %s1065_s29 = smov %s967_s22 }
 0x278   :  { %22 = sbr.rel (!%p20_p12) target bundleno = 7 (0x7), region = 96 }
 0x27d   :  { %542 = vsyncpa [#allocation4], 1 }
 0x27e   :  { %544 = vsyncpa [#allocation4 + $0x1], 1 }
 0x27f   :  { %545 = vsyncpa [#allocation6], 1 }

</bundles_post_ra>
